<compile_context>
chip_gen: v7x
topology: tpu7x:2x2x1
jax: 0.10.0
libtpu: 0.0.40
codegen_flags: <defaults>
</compile_context>

<pallas_src>
import jax
import jax.numpy as jnp
from jax.experimental import pallas as pl
from jax.experimental.pallas import tpu as pltpu

HIGHEST = jax.lax.Precision.HIGHEST


# --------------------------------------------------------------------------
# pltpu.roll convention probe (tiny kernel, run once, cached)
# --------------------------------------------------------------------------
def _roll_probe_kernel(x_ref, o_ref):
    o_ref[...] = pltpu.roll(x_ref[...], 1, axis=1)


def _probe_roll_convention():
    x = jax.lax.broadcasted_iota(jnp.float32, (8, 128), 1)
    y = pl.pallas_call(
        _roll_probe_kernel,
        out_shape=jax.ShapeDtypeStruct((8, 128), jnp.float32),
    )(x)
    # jnp.roll(x, 1) puts x[..., 127] at position 0.
    return bool(y[0, 0] == 127.0)


_ROLL_MATCHES_JNP_CACHE = None


def _roll_matches_jnp():
    global _ROLL_MATCHES_JNP_CACHE
    if _ROLL_MATCHES_JNP_CACHE is None:
        _ROLL_MATCHES_JNP_CACHE = _probe_roll_convention()
    return _ROLL_MATCHES_JNP_CACHE


# --------------------------------------------------------------------------
# Fused TinyVGG kernel (one batch element per grid step)
# --------------------------------------------------------------------------
def _make_tinyvgg_kernel(img_h, img_w, hidden, nout, roll_matches_jnp):
    hw = img_h * img_w

    def read_shifted(x, offset):
        """y with y[..., i] = x[..., (i + offset) % hw] (XLU lane rotation)."""
        off = offset % hw
        if off == 0:
            return x
        amount = (hw - off) % hw if roll_matches_jnp else off
        return pltpu.roll(x, amount, axis=x.ndim - 1)

    # Tap shifts for the two spatial scales (stride 1 and stride 2).
    shifts_s1 = [(kh - 1) * img_w + (kw - 1)
                 for kh in range(3) for kw in range(3)]
    shifts_s2 = [2 * s for s in shifts_s1]

    def kernel(x_ref, masks_ref, w1, b1, w2, b2, w3, b3, w4, b4,
               wl_ref, bl_ref, o_ref, patch_ref):

        def conv3x3_relu(f, w_ref, b_ref, mask_base, shifts):
            # 9 masked taps -> one (9*hidden, hw) patch matrix in VMEM scratch
            # (aligned static 8-row f32 writes), then ONE MXU matmul.
            for t in range(9):
                shifted = read_shifted(f, shifts[t])
                if t == 4:                          # centre tap: always valid
                    tap = shifted
                else:
                    m = masks_ref[mask_base + t:mask_base + t + 1, :]  # (1, hw)
                    tap = shifted * m
                patch_ref[t * hidden:(t + 1) * hidden, :] = tap
            out = jnp.dot(w_ref[...], patch_ref[...],
                          preferred_element_type=jnp.float32)          # (hidden, hw)
            return jnp.maximum(out + b_ref[...], 0.0)

        def maxpool2x2(f, step):
            out = f
            for s in (step, step * img_w, step * img_w + step):
                out = jnp.maximum(out, read_shifted(f, s))
            return out

        f = x_ref[...]                                   # (hidden, hw) f32
        # conv_block_1
        f = conv3x3_relu(f, w1, b1, 0, shifts_s1)
        f = conv3x3_relu(f, w2, b2, 0, shifts_s1)
        f = maxpool2x2(f, 1)                             # valid @ stride 2
        # conv_block_2 (on the stride-2 dilated grid)
        f = conv3x3_relu(f, w3, b3, 9, shifts_s2)
        f = conv3x3_relu(f, w4, b4, 9, shifts_s2)
        f = maxpool2x2(f, 2)                             # valid @ stride 4

        # Classifier: logits[n] = sum_{c,l} f[c,l] * wl[n,c,l] + bl[n].
        # wl rows are pre-scattered onto the dilated grid with exact zeros at
        # invalid lanes, so dilated garbage never contributes.  Pure VPU/XLU:
        # 10 multiplies of (hidden, hw) + reductions; no MXU, no transposes.
        lane = jax.lax.broadcasted_iota(jnp.int32, (1, nout), 1)
        logits = bl_ref[...]                             # (1, nout)
        for n in range(nout):
            prod = f * wl_ref[n]                                        # (hidden, hw)
            s = jnp.sum(jnp.sum(prod, axis=1, keepdims=True),
                        axis=0, keepdims=True)                          # (1, 1)
            logits = logits + jnp.where(lane == n, s, 0.0)
        o_ref[...] = logits

    return kernel


# --------------------------------------------------------------------------
# Host-side packing (runs once, outside the per-call path)
# --------------------------------------------------------------------------
def _make_mask_table(img_h, img_w):
    """(18, hw) f32: rows 0-8 stride-1 tap masks, rows 9-17 stride-2 masks."""
    hw = img_h * img_w
    lane = jnp.arange(hw)
    rows = []
    for step in (1, 2):
        sy, sx = img_h // step, img_w // step
        yy = (lane // img_w) // step
        xx = (lane % img_w) // step
        for kh in range(3):
            for kw in range(3):
                dy, dx = kh - 1, kw - 1
                valid = ((yy + dy >= 0) & (yy + dy < sy) &
                         (xx + dx >= 0) & (xx + dx < sx))
                rows.append(valid.astype(jnp.float32))
    return jnp.stack(rows, axis=0)                       # (18, hw)


def pack_params(params, img_h=64, img_w=64):
    hidden = params["w1"].shape[0]
    nout = params["wl"].shape[0]
    hw = img_h * img_w

    def pack_conv(w):
        cout, c_in = w.shape[0], w.shape[1]
        if c_in < hidden:                                # pad Cin -> hidden
            w = jnp.pad(w, ((0, 0), (0, hidden - c_in), (0, 0), (0, 0)))
        # OIHW -> (kh, kw, cin, cout) -> (9*hidden, cout) -> (cout, 9*hidden)
        return jnp.transpose(w, (2, 3, 1, 0)).reshape(9 * hidden, cout).T \
                  .astype(jnp.float32)

    packed = {
        "w1": pack_conv(params["w1"]), "w2": pack_conv(params["w2"]),
        "w3": pack_conv(params["w3"]), "w4": pack_conv(params["w4"]),
        "b1": params["b1"].reshape(hidden, 1).astype(jnp.float32),
        "b2": params["b2"].reshape(hidden, 1).astype(jnp.float32),
        "b3": params["b3"].reshape(hidden, 1).astype(jnp.float32),
        "b4": params["b4"].reshape(hidden, 1).astype(jnp.float32),
    }

    # Classifier weights as (nout, hidden, hw), scattered onto the stride-4
    # dilated grid in torch.nn.Flatten (NCHW) order: flat = c*256 + py*16 + px.
    ph, pw = img_h // 4, img_w // 4
    wl = params["wl"].reshape(nout, hidden, ph, pw).astype(jnp.float32)
    scat = jnp.zeros((nout, hidden, img_h, img_w), jnp.float32)
    scat = scat.at[:, :, ::4, ::4].set(wl)
    packed["wl"] = scat.reshape(nout, hidden, hw)
    packed["bl"] = params["bl"].reshape(1, nout).astype(jnp.float32)
    packed["masks"] = _make_mask_table(img_h, img_w)
    return packed


def build_tiny_vgg_forward(img_h, img_w, hidden, nout):
    hw = img_h * img_w
    kernel = _make_tinyvgg_kernel(img_h, img_w, hidden, nout,
                                  _roll_matches_jnp())
    const2 = lambda bi: (0, 0)
    const3 = lambda bi: (0, 0, 0)

    @jax.jit
    def forward(x_nchw, packed):
        b, cin = x_nchw.shape[0], x_nchw.shape[1]
        x = x_nchw.reshape(b, cin, hw).astype(jnp.float32)     # free reshape
        if cin < hidden:
            x = jnp.pad(x, ((0, 0), (0, hidden - cin), (0, 0)))

        out = pl.pallas_call(
            kernel,
            out_shape=jax.ShapeDtypeStruct((b, 1, nout), jnp.float32),
            grid=(b,),
            in_specs=[
                pl.BlockSpec((None, hidden, hw), lambda bi: (bi, 0, 0)),   # x
                pl.BlockSpec((18, hw), const2),                   # mask table
                pl.BlockSpec((hidden, 9 * hidden), const2),       # w1
                pl.BlockSpec((hidden, 1), const2),                # b1
                pl.BlockSpec((hidden, 9 * hidden), const2),       # w2
                pl.BlockSpec((hidden, 1), const2),                # b2
                pl.BlockSpec((hidden, 9 * hidden), const2),       # w3
                pl.BlockSpec((hidden, 1), const2),                # b3
                pl.BlockSpec((hidden, 9 * hidden), const2),       # w4
                pl.BlockSpec((hidden, 1), const2),                # b4
                pl.BlockSpec((nout, hidden, hw), const3),         # wl (scattered)
                pl.BlockSpec((1, nout), const2),                  # bl
            ],
            out_specs=pl.BlockSpec((None, 1, nout), lambda bi: (bi, 0, 0)),
            scratch_shapes=[pltpu.VMEM((9 * hidden, hw), jnp.float32)],
            compiler_params=pltpu.CompilerParams(
                dimension_semantics=("parallel",),
                vmem_limit_bytes=32 * 1024 * 1024),
        )(x, packed["masks"],
          packed["w1"], packed["b1"], packed["w2"], packed["b2"],
          packed["w3"], packed["b3"], packed["w4"], packed["b4"],
          packed["wl"], packed["bl"])
        return out[:, 0, :]

    return forward


# --------------------------------------------------------------------------
# Pure-JAX reference (f32 HIGHEST precision)
# --------------------------------------------------------------------------
def tiny_vgg_reference(x_nchw, params):
    def conv_relu(x, w, b):
        y = jax.lax.conv_general_dilated(
            x, w, window_strides=(1, 1), padding=((1, 1), (1, 1)),
            dimension_numbers=("NCHW", "OIHW", "NCHW"), precision=HIGHEST)
        return jax.nn.relu(y + b[None, :, None, None])

    def maxpool(x):
        return jax.lax.reduce_window(
            x, -jnp.inf, jax.lax.max, (1, 1, 2, 2), (1, 1, 2, 2), "VALID")

    x = conv_relu(x_nchw, params["w1"], params["b1"])
    x = conv_relu(x, params["w2"], params["b2"])
    x = maxpool(x)
    x = conv_relu(x, params["w3"], params["b3"])
    x = conv_relu(x, params["w4"], params["b4"])
    x = maxpool(x)
    flat = x.reshape(x.shape[0], -1)
    return jnp.dot(flat, params["wl"].T, precision=HIGHEST) + params["bl"]


# --------------------------------------------------------------------------
# Deterministic parameter init (PyTorch-style kaiming-uniform bounds)
# --------------------------------------------------------------------------
def _init_conv(key, cin, cout):
    k1, k2 = jax.random.split(key)
    bound = 1.0 / (cin * 9) ** 0.5
    w = jax.random.uniform(k1, (cout, cin, 3, 3), jnp.float32, -bound, bound)
    b = jax.random.uniform(k2, (cout,), jnp.float32, -bound, bound)
    return w, b


def _init_linear(key, fin, fout):
    k1, k2 = jax.random.split(key)
    bound = 1.0 / fin ** 0.5
    w = jax.random.uniform(k1, (fout, fin), jnp.float32, -bound, bound)
    b = jax.random.uniform(k2, (fout,), jnp.float32, -bound, bound)
    return w, b


def make_params(key, input_shape, hidden_units, output_shape):
    ks = jax.random.split(key, 5)
    w1, b1 = _init_conv(ks[0], input_shape, hidden_units)
    w2, b2 = _init_conv(ks[1], hidden_units, hidden_units)
    w3, b3 = _init_conv(ks[2], hidden_units, hidden_units)
    w4, b4 = _init_conv(ks[3], hidden_units, hidden_units)
    wl, bl = _init_linear(ks[4], hidden_units * 16 * 16, output_shape)
    return dict(w1=w1, b1=b1, w2=w2, b2=b2, w3=w3, b3=b3, w4=w4, b4=b4,
                wl=wl, bl=bl)


# --------------------------------------------------------------------------
if __name__ == "__main__":
    key = jax.random.PRNGKey(0)
    k_param, k_x = jax.random.split(key)

    # classifier in_features = hidden_units*16*16 forces 64x64 input spatial.
    B, Cin, Himg, Wimg = 2, 3, 64, 64
    hidden_units, output_shape = 8, 10

    params = make_params(k_param, Cin, hidden_units, output_shape)
    packed = pack_params(params, Himg, Wimg)          # one-time weight packing
    x = jax.random.normal(k_x, (B, Cin, Himg, Wimg), jnp.float32)

    tiny_vgg_forward = build_tiny_vgg_forward(Himg, Wimg, hidden_units,
                                              output_shape)
    logits = tiny_vgg_forward(x, packed)
    jax.block_until_ready(logits)

    assert logits.shape == (B, output_shape), logits.shape

    ref = tiny_vgg_reference(x, params)
    # Kernel uses default MXU precision (bf16 operand rounding, f32 accumulate)
    # for the convs; reference is f32 HIGHEST -> accepted tolerance 3e-2.
    assert jnp.allclose(logits, ref, atol=3e-2, rtol=3e-2), (
        float(jnp.max(jnp.abs(logits - ref))))

    print("KERNEL_OK")
</pallas_src>

<mosaic_0001>
module attributes {stable_mosaic.version = 11 : i64} {
  func.func @_roll_probe_kernel(%arg0: memref<8x128xf32, #tpu.memory_space<vmem>>, %arg1: memref<8x128xf32, #tpu.memory_space<vmem>>) attributes {dimension_semantics = [], scalar_prefetch = 0 : i64, scratch_operands = 0 : i64, tpu.core_type = #tpu.core_type<tc>} {
    %c0 = arith.constant 0 : index
    %c0_0 = arith.constant 0 : index
    %0 = vector.load %arg0[%c0, %c0_0] : memref<8x128xf32, #tpu.memory_space<vmem>>, vector<8x128xf32>
    %c1_i32 = arith.constant 1 : i32
    %1 = tpu.dynamic_rotate %0 by %c1_i32 dim 1 : vector<8x128xf32>, i32 -> vector<8x128xf32>
    %c0_1 = arith.constant 0 : index
    %c0_2 = arith.constant 0 : index
    %2 = vector.load %arg1[%c0_1, %c0_2] : memref<8x128xf32, #tpu.memory_space<vmem>>, vector<8x128xf32>
    tpu.vector_store %arg1[%c0_1, %c0_2], %1 {strides = array<i32>} : memref<8x128xf32, #tpu.memory_space<vmem>>, vector<8x128xf32>,
    return
  }
}

</mosaic_0001>

<bundles_post_ra>
// kernel: tpu_custom_call.1
= control target key start
LH: loop header
LB: loop body
LE: loop exit
PB: predicated region body
PF: predicated region fallthrough
CT: control target
= control target key end

     0   :  { %6 = vsyncpa [#allocation3], 0  ;;  %s128_s0 = inlined_call_operand.hbm [shape: f32[8,128], index: 0, kind: input, shape index: {}]   ;;  %s129_s1 = inlined_call_operand.hbm [shape: f32[8,128], index: 1, kind: output, shape index: {}]  }
   0x1   :  { %7 = vsyncpa [#allocation4], 0  ;;  %s91_s6 = smov [#allocation2]   ;;  %s43_s10 = scalar_lea.hbm %s128_s0, 128 }
   0x2   :  { %s14_s7 = sshll.u32 %s91_s6, 4  ;;  %p44_p0 = scmp.ne.s32.totalorder %s128_s0, %s43_s10  ;;  %s15_s7 = int_to_ptr.vmem [resolvable:$true] %s14_s7 }
   0x3   :  { %p47_p1 = scmp.lt.u32.totalorder %s43_s10, %s128_s0 }
   0x5   :  { %p49_p2 = pnand %p47_p1, %p44_p0 }
   0x7   :  { %52 = shalt.err (!%p49_p2)
}
   0x8   :  { %s53_s15 = scalar_lea.vmem %s15_s7, 128  ;;  %p58_p4 = scmp.lt.s32.totalorder %s15_s7, %s15_s7 }
   0x9   :  { %p54_p3 = scmp.ne.s32.totalorder %s15_s7, %s53_s15  ;;  %p59_p5 = scmp.lt.s32.totalorder %s53_s15, %s53_s15 }
   0xb   :  { %p60_p6 = por %p59_p5, %p58_p4 }
   0xd   :  { %p61_p7 = pnand %p60_p6, %p54_p3 }
   0xf   :  { %64 = shalt.err (!%p61_p7)
}
  0x10   :  { %17 = dma.hbm_to_vmem [thread:$0]  %s128_s0, 128, %s15_s7, [#allocation3]  }
  0x11   :  { %87 = dma.done.wait [#allocation3], 128  }
  0x12   :  { %88 = vsyncadd [#allocation3], 4294967168  ;;  %v21_v0 = vld [vmem:[#allocation2] sm:$0xff]  ;;  %s92_s18 = smov 1   ;;  %s93_s19 = smov [#allocation5]  }
  0x13   :  { %22 = vrot.lane.b32.xlu0 %v21_v0, %s92_s18  ;;  %s31_s20 = sshll.u32 %s93_s19, 4  ;;  %s32_s20 = int_to_ptr.vmem [resolvable:$true] %s31_s20 }
  0x14   :  { %s65_s21 = scalar_lea.vmem %s32_s20, 128  ;;  %p70_p9 = scmp.lt.s32.totalorder %s32_s20, %s32_s20 }
  0x15   :  { %p66_p8 = scmp.ne.s32.totalorder %s32_s20, %s65_s21  ;;  %p71_p10 = scmp.lt.s32.totalorder %s65_s21, %s65_s21 }
  0x17   :  { %p72_p11 = por %p71_p10, %p70_p9 }
  0x19   :  { %p73_p12 = pnand %p72_p11, %p66_p8 }
  0x85   :  { %v23_v1 = vpop.permute.xlu0 %22 }
  0x86   :  { %24 = vst [vmem:[#allocation5] sm:$0xff] %v23_v1 }
  0x87   :  { %76 = shalt.err (!%p73_p12)
}
  0x88   :  { %s77_s0 = scalar_lea.hbm %s129_s1, 128 }
  0x89   :  { %p78_p13 = scmp.ne.s32.totalorder %s129_s1, %s77_s0  ;;  %p81_p0 = scmp.lt.u32.totalorder %s77_s0, %s129_s1 }
  0x8b   :  { %p83_p1 = pnand %p81_p0, %p78_p13 }
  0x8d   :  { %86 = shalt.err (!%p83_p1)
}
  0x8e   :  { %34 = dma.vmem_to_hbm [thread:$0]  %s32_s20, 128, %s129_s1, [#allocation4]  }
  0x8f   :  { %89 = dma.done.wait [#allocation4], 128  }
  0x90   :  { %90 = vsyncadd [#allocation4], 4294967168 }
  0x91   :  { %38 = vsyncpa [#allocation3], 1 }
  0x92   :  { %39 = vsyncpa [#allocation4], 1 }

</bundles_post_ra>
